<compile_context>
chip_gen: v5e
topology: v5e:2x2
jax: 0.10.0
libtpu: 0.0.40
codegen_flags: <defaults>
</compile_context>

<pallas_src>
import functools

import jax
import jax.numpy as jnp
import numpy as np
from jax.experimental import pallas as pl
from jax.experimental.pallas import tpu as pltpu

_LANES = 128
_SUBLANES = 8


def _dice_partial_kernel(pred_ref, target_ref, inter_ref, denom_ref, *,
                         valid_len, tile_rows, tiles_per_core, needs_mask):
    k = pl.program_id(1)            # tile index within this core's range

    @pl.when(k == 0)
    def _init():
        inter_ref[...] = jnp.zeros_like(inter_ref)
        denom_ref[...] = jnp.zeros_like(denom_ref)

    x = pred_ref[...].astype(jnp.float32)
    # sigmoid(x) == 0.5*(tanh(0.5*x)+1): one EUP op per sigmoid. Two sigmoids
    # per element reproduce the module's forward() + dice_loss() double sigmoid.
    p = 0.5 * (jnp.tanh(0.5 * x) + 1.0)
    p = 0.5 * (jnp.tanh(0.5 * p) + 1.0)
    t = target_ref[...].astype(jnp.float32)

    def fold8(v):
        # (n, tile_rows, 128) -> (n, 8, 128): sum sublane-aligned 8-row groups.
        # The reshape splits the sublane axis on a tile boundary (free) and the
        # reduction over the group axis is pure VPU vreg adds (no XLU).
        n = v.shape[0]
        return jnp.sum(v.reshape(n, tile_rows // _SUBLANES, _SUBLANES, _LANES),
                       axis=1)

    def accumulate(pv, tv):
        inter_ref[...] += fold8(pv * tv)     # intersection partial
        denom_ref[...] += fold8(pv + tv)     # merged P + T partial

    if needs_mask:
        # Global tile index; phantom tiles (core split remainder) start past
        # valid_len and are fully masked to zero.
        gk = pl.program_id(0) * tiles_per_core + k
        tile_start = gk * (tile_rows * _LANES)
        is_tail = tile_start + tile_rows * _LANES > valid_len

        @pl.when(jnp.logical_not(is_tail))
        def _interior():
            accumulate(p, t)

        @pl.when(is_tail)
        def _tail():
            row = jax.lax.broadcasted_iota(jnp.int32, p.shape, 1)
            lane = jax.lax.broadcasted_iota(jnp.int32, p.shape, 2)
            valid = (tile_start + row * _LANES + lane) < valid_len
            # Mask BOTH streams: the overhang region of the last block (and any
            # phantom block) holds unspecified data for pred AND target.
            accumulate(jnp.where(valid, p, 0.0), jnp.where(valid, t, 0.0))
    else:
        accumulate(p, t)


def _expand_onehot_labels_dice(pred, target):
    """Plain-JAX glue mirroring the PyTorch helper (used when shapes differ).

    Emits bf16 one-hot (values are exactly 0/1) to halve the target HBM stream.
    """
    num_classes = pred.shape[1]
    t = jnp.clip(target.astype(jnp.int32), 0, num_classes)
    oh = jax.nn.one_hot(t, num_classes + 1, dtype=jnp.bfloat16)[..., :num_classes]
    return jnp.transpose(oh, (0, 3, 1, 2))  # (N, H, W, C) -> (N, C, H, W)


def _auto_budget():
    """Generation-aware (tile elements, vmem_limit_bytes).

    v5e/v6e have 128 MiB VMEM -> big tiles amortize the ~0.35us per-step
    overhead; v7x has only 64 MiB per TensorCore -> stay conservative so
    double-buffered inputs still fit and DMA/compute overlap survives.
    """
    vmem_cap = None
    try:
        vmem_cap = int(pltpu.get_tpu_info().vmem_capacity_bytes)
    except Exception:
        vmem_cap = None
    if vmem_cap is not None and vmem_cap > 96 * 1024 * 1024:
        return 2 * 1024 * 1024, 96 * 1024 * 1024      # v5e / v6e
    return 1 * 1024 * 1024, 48 * 1024 * 1024          # v7x or unknown


def dice_loss_old_forward(pred, target, *, eps=1e-10, loss_weight=1.0,
                          max_block_elems=None, vmem_limit_bytes=None):
    """Equivalent of DiceLoss_old()(pred, target) with default ctor args.

    Accepts f32 or bf16 pred; binary targets may be f32/bf16 (same-shape path)
    or integer class labels (one-hot expansion path). max_block_elems is the
    per-input tile size in elements (auto-tuned per TPU generation if None).
    """
    if pred.shape != target.shape:
        target = _expand_onehot_labels_dice(pred, target)

    n = int(pred.shape[0])
    l = int(np.prod(pred.shape[1:]))

    auto_elems, auto_vmem = _auto_budget()
    if max_block_elems is None:
        max_block_elems = auto_elems
    if vmem_limit_bytes is None:
        vmem_limit_bytes = auto_vmem

    pred2 = pred.reshape(n, l)
    target2 = target.reshape(n, l)

    # Lane-dense (n, r, 128) layout. Pad ONLY when l is not a multiple of 1024
    # (8*128); 1024-aligned shapes stream with no extra HBM pass even when the
    # tile size does not divide r (overhanging last block, masked in-kernel).
    if l % (_SUBLANES * _LANES) != 0:
        # TODO(synk): this lane-alignment pad is still one extra HBM copy for
        # truly unaligned flatten lengths; removing it would need a manual,
        # non-rectangular DMA tail path.
        l_pad = -(-l // (_SUBLANES * _LANES)) * (_SUBLANES * _LANES)
        pred2 = jnp.pad(pred2, ((0, 0), (0, l_pad - l)))
        target2 = jnp.pad(target2, ((0, 0), (0, l_pad - l)))
    else:
        l_pad = l
    r = l_pad // _LANES                       # multiple of 8 by construction
    pred3 = pred2.reshape(n, r, _LANES)
    target3 = target2.reshape(n, r, _LANES)

    # Tile rows (multiple of 8, capped by the full row count).
    tr = (max_block_elems // (n * _LANES)) // _SUBLANES * _SUBLANES
    tr = max(_SUBLANES, min(tr, r))
    num_tiles = -(-r // tr)                   # cdiv; last block may overhang r
    nsplit = 2 if num_tiles > 1 else 1        # 2-way TensorCore split (v7x)
    tpc = -(-num_tiles // nsplit)             # tiles per core (+ phantom if odd)
    needs_mask = (nsplit * tpc * tr * _LANES != l)

    kernel = functools.partial(
        _dice_partial_kernel,
        valid_len=l, tile_rows=tr, tiles_per_core=tpc, needs_mask=needs_mask)

    def in_map(c, k):
        # Clamp phantom steps to the last real block (no extra DMA; the kernel
        # masks their contribution to zero).
        return (0, jnp.minimum(c * tpc + k, num_tiles - 1), 0)

    out_map = lambda c, k: (c, 0, 0, 0)
    part_shape = jax.ShapeDtypeStruct((nsplit, n, _SUBLANES, _LANES), jnp.float32)

    bytes_accessed = (pred3.size * pred3.dtype.itemsize
                      + target3.size * target3.dtype.itemsize
                      + 2 * nsplit * n * _SUBLANES * _LANES * 4)
    cost = pl.CostEstimate(flops=8 * n * l_pad,
                           transcendentals=2 * n * l_pad,
                           bytes_accessed=bytes_accessed)

    inter_p, denom_p = pl.pallas_call(
        kernel,
        out_shape=(part_shape, part_shape),
        grid_spec=pltpu.PrefetchScalarGridSpec(
            num_scalar_prefetch=0,
            grid=(nsplit, tpc),
            in_specs=[
                pl.BlockSpec((n, tr, _LANES), in_map),
                pl.BlockSpec((n, tr, _LANES), in_map),
            ],
            out_specs=(
                pl.BlockSpec((None, n, _SUBLANES, _LANES), out_map),
                pl.BlockSpec((None, n, _SUBLANES, _LANES), out_map),
            ),
        ),
        compiler_params=pltpu.CompilerParams(
            dimension_semantics=("parallel", "arbitrary"),
            vmem_limit_bytes=vmem_limit_bytes,
        ),
        cost_estimate=cost,
    )(pred3, target3)

    # Tiny per-core partial combine + dice/mean finalization in plain JAX.
    inter = jnp.sum(inter_p, axis=(0, 2, 3))      # (n,)
    denom = jnp.sum(denom_p, axis=(0, 2, 3))      # (n,)  == P_n + T_n
    dice = (2.0 * inter + eps) / (denom + eps)
    # reduction='mean', weight=None, avg_factor=None -> simple batch mean.
    return loss_weight * jnp.mean(1.0 - dice)


def _reference(pred, target, *, eps=1e-10, loss_weight=1.0):
    """Pure-JAX reference for a sanity check."""
    if pred.shape != target.shape:
        target = _expand_onehot_labels_dice(pred, target)
    p = jax.nn.sigmoid(jax.nn.sigmoid(pred.astype(jnp.float32)))
    t = target.astype(jnp.float32)
    axes = tuple(range(1, pred.ndim))
    inter = jnp.sum(p * t, axis=axes)
    pc = jnp.sum(p, axis=axes)
    tc = jnp.sum(t, axis=axes)
    dice = (2.0 * inter + eps) / (pc + tc + eps)
    return loss_weight * jnp.mean(1.0 - dice)


if __name__ == "__main__":
    key = jax.random.PRNGKey(0)
    k1, k2, k3, k4 = jax.random.split(key, 4)

    # Case 1: docstring shape (N, 1, H, W), binary float target. L=256 -> lane
    # pad to 1024, single tile, exercises the masked-tail path.
    N, C, H, W = 2, 1, 16, 16
    pred = jax.random.normal(k1, (N, C, H, W), dtype=jnp.float32)
    target = (jax.random.uniform(k2, (N, C, H, W)) > 0.5).astype(jnp.float32)
    out = jax.block_until_ready(dice_loss_old_forward(pred, target))
    ref = _reference(pred, target)
    assert np.allclose(np.asarray(out), np.asarray(ref), rtol=1e-4, atol=1e-5), (out, ref)

    # Case 2: multi-tile + 2-way core split + ragged tail (L = 3*40*40 = 4800)
    # with a deliberately tiny tile -> grid (2, 3) with one phantom tile.
    pred2 = jax.random.normal(k3, (2, 3, 40, 40), dtype=jnp.float32)
    tgt2 = (jax.random.uniform(k4, (2, 3, 40, 40)) > 0.5).astype(jnp.float32)
    out2 = jax.block_until_ready(
        dice_loss_old_forward(pred2, tgt2, max_block_elems=2048))
    ref2 = _reference(pred2, tgt2)
    assert np.allclose(np.asarray(out2), np.asarray(ref2), rtol=1e-4, atol=1e-5), (out2, ref2)

    # Case 3: class-label target (shape mismatch -> bf16 one-hot expansion),
    # bf16 pred in HBM; L = 4*16*16 = 1024 -> fully aligned, pad-free and
    # mask-free fast path.
    predc = jax.random.normal(k3, (2, 4, 16, 16), dtype=jnp.bfloat16)
    labels = jax.random.randint(k4, (2, 16, 16), 0, 4)
    out3 = jax.block_until_ready(dice_loss_old_forward(predc, labels))
    ref3 = _reference(predc, labels)
    assert np.allclose(np.asarray(out3), np.asarray(ref3), rtol=1e-4, atol=1e-4), (out3, ref3)

    print("KERNEL_OK")
</pallas_src>

<mosaic_0001>
module attributes {stable_mosaic.version = 11 : i64} {
  func.func @_dice_partial_kernel(%arg0: i32, %arg1: i32, %arg2: memref<2x8x128xf32, #tpu.memory_space<vmem>>, %arg3: memref<2x8x128xf32, #tpu.memory_space<vmem>>, %arg4: memref<1x2x8x128xf32, #tpu.memory_space<vmem>>, %arg5: memref<1x2x8x128xf32, #tpu.memory_space<vmem>>) attributes {dimension_semantics = [#tpu.dimension_semantics<parallel>, #tpu.dimension_semantics<arbitrary>], iteration_bounds = array<i64: 1, 1>, scalar_prefetch = 0 : i64, scratch_operands = 0 : i64, tpu.core_type = #tpu.core_type<tc>, window_params = [{transform_indices = @transform_0, window_bounds = array<i64: 2, 8, 128>}, {transform_indices = @transform_1, window_bounds = array<i64: 2, 8, 128>}, {transform_indices = @transform_2, window_bounds = array<i64: 1, 2, 8, 128>}, {transform_indices = @transform_3, window_bounds = array<i64: 1, 2, 8, 128>}]} {
    %c0_i32 = arith.constant 0 : i32
    %0 = arith.cmpi eq, %arg1, %c0_i32 : i32
    %1 = arith.extui %0 : i1 to i32
    %c0_i32_0 = arith.constant 0 : i32
    %2 = arith.cmpi ne, %1, %c0_i32_0 : i32
    scf.if %2 {
      %cst_14 = arith.constant 0.000000e+00 : f32
      %29 = vector.broadcast %cst_14 : f32 to vector<2x8x128xf32>
      %c0_15 = arith.constant 0 : index
      %c0_16 = arith.constant 0 : index
      %c0_17 = arith.constant 0 : index
      %c0_18 = arith.constant 0 : index
      %30 = vector.load %arg4[%c0_15, %c0_16, %c0_17, %c0_18] : memref<1x2x8x128xf32, #tpu.memory_space<vmem>>, vector<1x2x8x128xf32>
      %31 = vector.shape_cast %30 : vector<1x2x8x128xf32> to vector<2x8x128xf32>
      %32 = vector.shape_cast %29 : vector<2x8x128xf32> to vector<1x2x8x128xf32>
      tpu.vector_store %arg4[%c0_15, %c0_16, %c0_17, %c0_18], %32 {strides = array<i32>} : memref<1x2x8x128xf32, #tpu.memory_space<vmem>>, vector<1x2x8x128xf32>,
      %cst_19 = arith.constant 0.000000e+00 : f32
      %33 = vector.broadcast %cst_19 : f32 to vector<2x8x128xf32>
      %c0_20 = arith.constant 0 : index
      %c0_21 = arith.constant 0 : index
      %c0_22 = arith.constant 0 : index
      %c0_23 = arith.constant 0 : index
      %34 = vector.load %arg5[%c0_20, %c0_21, %c0_22, %c0_23] : memref<1x2x8x128xf32, #tpu.memory_space<vmem>>, vector<1x2x8x128xf32>
      %35 = vector.shape_cast %34 : vector<1x2x8x128xf32> to vector<2x8x128xf32>
      %36 = vector.shape_cast %33 : vector<2x8x128xf32> to vector<1x2x8x128xf32>
      tpu.vector_store %arg5[%c0_20, %c0_21, %c0_22, %c0_23], %36 {strides = array<i32>} : memref<1x2x8x128xf32, #tpu.memory_space<vmem>>, vector<1x2x8x128xf32>,
    } else {
    }
    %c0 = arith.constant 0 : index
    %c0_1 = arith.constant 0 : index
    %c0_2 = arith.constant 0 : index
    %3 = vector.load %arg2[%c0, %c0_1, %c0_2] : memref<2x8x128xf32, #tpu.memory_space<vmem>>, vector<2x8x128xf32>
    %cst = arith.constant 5.000000e-01 : f32
    %4 = vector.broadcast %cst : f32 to vector<2x8x128xf32>
    %5 = arith.mulf %4, %3 : vector<2x8x128xf32>
    %6 = math.tanh %5 : vector<2x8x128xf32>
    %cst_3 = arith.constant 1.000000e+00 : f32
    %7 = vector.broadcast %cst_3 : f32 to vector<2x8x128xf32>
    %8 = arith.addf %6, %7 : vector<2x8x128xf32>
    %cst_4 = arith.constant 5.000000e-01 : f32
    %9 = vector.broadcast %cst_4 : f32 to vector<2x8x128xf32>
    %10 = arith.mulf %9, %8 : vector<2x8x128xf32>
    %cst_5 = arith.constant 5.000000e-01 : f32
    %11 = vector.broadcast %cst_5 : f32 to vector<2x8x128xf32>
    %12 = arith.mulf %11, %10 : vector<2x8x128xf32>
    %13 = math.tanh %12 : vector<2x8x128xf32>
    %cst_6 = arith.constant 1.000000e+00 : f32
    %14 = vector.broadcast %cst_6 : f32 to vector<2x8x128xf32>
    %15 = arith.addf %13, %14 : vector<2x8x128xf32>
    %cst_7 = arith.constant 5.000000e-01 : f32
    %16 = vector.broadcast %cst_7 : f32 to vector<2x8x128xf32>
    %17 = arith.mulf %16, %15 : vector<2x8x128xf32>
    %c0_8 = arith.constant 0 : index
    %c0_9 = arith.constant 0 : index
    %c0_10 = arith.constant 0 : index
    %18 = vector.load %arg3[%c0_8, %c0_9, %c0_10] : memref<2x8x128xf32, #tpu.memory_space<vmem>>, vector<2x8x128xf32>
    %c1_i32 = arith.constant 1 : i32
    %19 = arith.muli %arg0, %c1_i32 : i32
    %20 = arith.addi %19, %arg1 : i32
    %c1024_i32 = arith.constant 1024 : i32
    %21 = arith.muli %20, %c1024_i32 : i32
    %c1024_i32_11 = arith.constant 1024 : i32
    %22 = arith.addi %21, %c1024_i32_11 : i32
    %c256_i32 = arith.constant 256 : i32
    %23 = arith.cmpi sgt, %22, %c256_i32 : i32
    %true = arith.constant true
    %24 = arith.xori %23, %true : i1
    %25 = arith.extui %24 : i1 to i32
    %c0_i32_12 = arith.constant 0 : i32
    %26 = arith.cmpi ne, %25, %c0_i32_12 : i32
    scf.if %26 {
      %c0_14 = arith.constant 0 : index
      %c0_15 = arith.constant 0 : index
      %c0_16 = arith.constant 0 : index
      %c0_17 = arith.constant 0 : index
      %29 = vector.load %arg4[%c0_14, %c0_15, %c0_16, %c0_17] : memref<1x2x8x128xf32, #tpu.memory_space<vmem>>, vector<1x2x8x128xf32>
      %30 = vector.shape_cast %29 : vector<1x2x8x128xf32> to vector<2x8x128xf32>
      %31 = arith.mulf %17, %18 : vector<2x8x128xf32>
      %32 = vector.shape_cast %31 : vector<2x8x128xf32> to vector<2x1x8x128xf32>
      %cst_18 = arith.constant dense<0.000000e+00> : vector<2x8x128xf32>
      %33 = vector.multi_reduction <add>, %32, %cst_18 [1] : vector<2x1x8x128xf32> to vector<2x8x128xf32>
      %34 = arith.addf %30, %33 : vector<2x8x128xf32>
      %c0_19 = arith.constant 0 : index
      %c0_20 = arith.constant 0 : index
      %c0_21 = arith.constant 0 : index
      %c0_22 = arith.constant 0 : index
      %35 = vector.load %arg4[%c0_19, %c0_20, %c0_21, %c0_22] : memref<1x2x8x128xf32, #tpu.memory_space<vmem>>, vector<1x2x8x128xf32>
      %36 = vector.shape_cast %35 : vector<1x2x8x128xf32> to vector<2x8x128xf32>
      %37 = vector.shape_cast %34 : vector<2x8x128xf32> to vector<1x2x8x128xf32>
      tpu.vector_store %arg4[%c0_19, %c0_20, %c0_21, %c0_22], %37 {strides = array<i32>} : memref<1x2x8x128xf32, #tpu.memory_space<vmem>>, vector<1x2x8x128xf32>,
      %c0_23 = arith.constant 0 : index
      %c0_24 = arith.constant 0 : index
      %c0_25 = arith.constant 0 : index
      %c0_26 = arith.constant 0 : index
      %38 = vector.load %arg5[%c0_23, %c0_24, %c0_25, %c0_26] : memref<1x2x8x128xf32, #tpu.memory_space<vmem>>, vector<1x2x8x128xf32>
      %39 = vector.shape_cast %38 : vector<1x2x8x128xf32> to vector<2x8x128xf32>
      %40 = arith.addf %17, %18 : vector<2x8x128xf32>
      %41 = vector.shape_cast %40 : vector<2x8x128xf32> to vector<2x1x8x128xf32>
      %cst_27 = arith.constant dense<0.000000e+00> : vector<2x8x128xf32>
      %42 = vector.multi_reduction <add>, %41, %cst_27 [1] : vector<2x1x8x128xf32> to vector<2x8x128xf32>
      %43 = arith.addf %39, %42 : vector<2x8x128xf32>
      %c0_28 = arith.constant 0 : index
      %c0_29 = arith.constant 0 : index
      %c0_30 = arith.constant 0 : index
      %c0_31 = arith.constant 0 : index
      %44 = vector.load %arg5[%c0_28, %c0_29, %c0_30, %c0_31] : memref<1x2x8x128xf32, #tpu.memory_space<vmem>>, vector<1x2x8x128xf32>
      %45 = vector.shape_cast %44 : vector<1x2x8x128xf32> to vector<2x8x128xf32>
      %46 = vector.shape_cast %43 : vector<2x8x128xf32> to vector<1x2x8x128xf32>
      tpu.vector_store %arg5[%c0_28, %c0_29, %c0_30, %c0_31], %46 {strides = array<i32>} : memref<1x2x8x128xf32, #tpu.memory_space<vmem>>, vector<1x2x8x128xf32>,
    } else {
    }
    %27 = arith.extui %23 : i1 to i32
    %c0_i32_13 = arith.constant 0 : i32
    %28 = arith.cmpi ne, %27, %c0_i32_13 : i32
    scf.if %28 {
      %29 = tpu.iota {dimensions = array<i32: 1>} : vector<2x8x128xi32>
      %30 = tpu.iota {dimensions = array<i32: 2>} : vector<2x8x128xi32>
      %c128_i32 = arith.constant 128 : i32
      %31 = vector.broadcast %c128_i32 : i32 to vector<2x8x128xi32>
      %32 = arith.muli %29, %31 : vector<2x8x128xi32>
      %33 = vector.broadcast %21 : i32 to vector<2x8x128xi32>
      %34 = arith.addi %33, %32 : vector<2x8x128xi32>
      %35 = arith.addi %34, %30 : vector<2x8x128xi32>
      %c256_i32_14 = arith.constant 256 : i32
      %36 = vector.broadcast %c256_i32_14 : i32 to vector<2x8x128xi32>
      %37 = arith.cmpi slt, %35, %36 : vector<2x8x128xi32>
      %cst_15 = arith.constant 0.000000e+00 : f32
      %38 = vector.broadcast %cst_15 : f32 to vector<2x8x128xf32>
      %39 = arith.select %37, %17, %38 : vector<2x8x128xi1>, vector<2x8x128xf32>
      %cst_16 = arith.constant 0.000000e+00 : f32
      %40 = vector.broadcast %cst_16 : f32 to vector<2x8x128xf32>
      %41 = arith.select %37, %18, %40 : vector<2x8x128xi1>, vector<2x8x128xf32>
      %c0_17 = arith.constant 0 : index
      %c0_18 = arith.constant 0 : index
      %c0_19 = arith.constant 0 : index
      %c0_20 = arith.constant 0 : index
      %42 = vector.load %arg4[%c0_17, %c0_18, %c0_19, %c0_20] : memref<1x2x8x128xf32, #tpu.memory_space<vmem>>, vector<1x2x8x128xf32>
      %43 = vector.shape_cast %42 : vector<1x2x8x128xf32> to vector<2x8x128xf32>
      %44 = arith.mulf %39, %41 : vector<2x8x128xf32>
      %45 = vector.shape_cast %44 : vector<2x8x128xf32> to vector<2x1x8x128xf32>
      %cst_21 = arith.constant dense<0.000000e+00> : vector<2x8x128xf32>
      %46 = vector.multi_reduction <add>, %45, %cst_21 [1] : vector<2x1x8x128xf32> to vector<2x8x128xf32>
      %47 = arith.addf %43, %46 : vector<2x8x128xf32>
      %c0_22 = arith.constant 0 : index
      %c0_23 = arith.constant 0 : index
      %c0_24 = arith.constant 0 : index
      %c0_25 = arith.constant 0 : index
      %48 = vector.load %arg4[%c0_22, %c0_23, %c0_24, %c0_25] : memref<1x2x8x128xf32, #tpu.memory_space<vmem>>, vector<1x2x8x128xf32>
      %49 = vector.shape_cast %48 : vector<1x2x8x128xf32> to vector<2x8x128xf32>
      %50 = vector.shape_cast %47 : vector<2x8x128xf32> to vector<1x2x8x128xf32>
      tpu.vector_store %arg4[%c0_22, %c0_23, %c0_24, %c0_25], %50 {strides = array<i32>} : memref<1x2x8x128xf32, #tpu.memory_space<vmem>>, vector<1x2x8x128xf32>,
      %c0_26 = arith.constant 0 : index
      %c0_27 = arith.constant 0 : index
      %c0_28 = arith.constant 0 : index
      %c0_29 = arith.constant 0 : index
      %51 = vector.load %arg5[%c0_26, %c0_27, %c0_28, %c0_29] : memref<1x2x8x128xf32, #tpu.memory_space<vmem>>, vector<1x2x8x128xf32>
      %52 = vector.shape_cast %51 : vector<1x2x8x128xf32> to vector<2x8x128xf32>
      %53 = arith.addf %39, %41 : vector<2x8x128xf32>
      %54 = vector.shape_cast %53 : vector<2x8x128xf32> to vector<2x1x8x128xf32>
      %cst_30 = arith.constant dense<0.000000e+00> : vector<2x8x128xf32>
      %55 = vector.multi_reduction <add>, %54, %cst_30 [1] : vector<2x1x8x128xf32> to vector<2x8x128xf32>
      %56 = arith.addf %52, %55 : vector<2x8x128xf32>
      %c0_31 = arith.constant 0 : index
      %c0_32 = arith.constant 0 : index
      %c0_33 = arith.constant 0 : index
      %c0_34 = arith.constant 0 : index
      %57 = vector.load %arg5[%c0_31, %c0_32, %c0_33, %c0_34] : memref<1x2x8x128xf32, #tpu.memory_space<vmem>>, vector<1x2x8x128xf32>
      %58 = vector.shape_cast %57 : vector<1x2x8x128xf32> to vector<2x8x128xf32>
      %59 = vector.shape_cast %56 : vector<2x8x128xf32> to vector<1x2x8x128xf32>
      tpu.vector_store %arg5[%c0_31, %c0_32, %c0_33, %c0_34], %59 {strides = array<i32>} : memref<1x2x8x128xf32, #tpu.memory_space<vmem>>, vector<1x2x8x128xf32>,
    } else {
    }
    return
  }
  func.func @transform_0(%arg0: i32, %arg1: i32) -> (i32, i32, i32) {
    %c1_i32 = arith.constant 1 : i32
    %0 = arith.muli %arg0, %c1_i32 : i32
    %1 = arith.addi %0, %arg1 : i32
    %c0_i32 = arith.constant 0 : i32
    %2 = arith.minsi %1, %c0_i32 : i32
    %c0_i32_0 = arith.constant 0 : i32
    %c0_i32_1 = arith.constant 0 : i32
    %c0_i32_2 = arith.constant 0 : i32
    return %c0_i32_0, %2, %c0_i32_1 : i32, i32, i32
  }
  func.func @transform_1(%arg0: i32, %arg1: i32) -> (i32, i32, i32) {
    %c1_i32 = arith.constant 1 : i32
    %0 = arith.muli %arg0, %c1_i32 : i32
    %1 = arith.addi %0, %arg1 : i32
    %c0_i32 = arith.constant 0 : i32
    %2 = arith.minsi %1, %c0_i32 : i32
    %c0_i32_0 = arith.constant 0 : i32
    %c0_i32_1 = arith.constant 0 : i32
    %c0_i32_2 = arith.constant 0 : i32
    return %c0_i32_0, %2, %c0_i32_1 : i32, i32, i32
  }
  func.func @transform_2(%arg0: i32, %arg1: i32) -> (i32, i32, i32, i32) {
    %c0_i32 = arith.constant 0 : i32
    %c0_i32_0 = arith.constant 0 : i32
    %c0_i32_1 = arith.constant 0 : i32
    %c0_i32_2 = arith.constant 0 : i32
    return %arg0, %c0_i32, %c0_i32_0, %c0_i32_1 : i32, i32, i32, i32
  }
  func.func @transform_3(%arg0: i32, %arg1: i32) -> (i32, i32, i32, i32) {
    %c0_i32 = arith.constant 0 : i32
    %c0_i32_0 = arith.constant 0 : i32
    %c0_i32_1 = arith.constant 0 : i32
    %c0_i32_2 = arith.constant 0 : i32
    return %arg0, %c0_i32, %c0_i32_0, %c0_i32_1 : i32, i32, i32, i32
  }
}

</mosaic_0001>

<bundles_post_ra>
// kernel: tpu_custom_call.1
= control target key start
LH: loop header
LB: loop body
LE: loop exit
PB: predicated region body
PF: predicated region fallthrough
CT: control target
= control target key end

     0   :  { %9 = vsyncpa [#allocation3], 0  ;;  %s366_s0 = inlined_call_operand.hbm [shape: f32[2,8,128], index: 0, kind: input, shape index: {}]   ;;  %s367_s1 = inlined_call_operand.hbm [shape: f32[2,8,128], index: 1, kind: input, shape index: {}]   ;;  %s368_s2 = inlined_call_operand.hbm [shape: f32[1,2,8,128], index: 2, kind: output, shape index: {0}]   ;;  %s369_s3 = inlined_call_operand.hbm [shape: f32[1,2,8,128], index: 3, kind: output, shape index: {1}]  }
   0x1   :  { %10 = vsyncpa [#allocation6], 0 }
   0x2   :  { %11 = vsyncpa [#allocation4], 0 }
   0x3   :  { %12 = vsyncpa [#allocation9], 0  ;;  %s22_s14 = sshll.u32 %s366_s0, 4  ;;  %s316_s15 = smov [#allocation2]   ;;  %s23_s14 = int_to_ptr.hbm [resolvable:$true] %s22_s14 }
   0x4   :  { %s24_s16 = sshll.u32 %s316_s15, 4  ;;  %s40_s19 = sshll.u32 %s367_s1, 4  ;;  %s25_s16 = int_to_ptr.vmem [resolvable:$true] %s24_s16  ;;  %s41_s19 = int_to_ptr.hbm [resolvable:$true] %s40_s19 }
   0x5   :  { %s317_s20 = smov 128   ;;  %s318_s21 = smov 8  }
   0x6   :  { %30 = dma.hbm_to_vmem [thread:$0]  %s23_s14, 256, %s25_s16, [#allocation3], %s317_s20, %s317_s20, %s318_s21  }
   0x7   :  { %s319_s22 = smov [#allocation5]  }
   0x8   :  { %s42_s23 = sshll.u32 %s319_s22, 4  ;;  %s43_s23 = int_to_ptr.vmem [resolvable:$true] %s42_s23 }
   0x9   :  { %48 = dma.hbm_to_vmem [thread:$0]  %s41_s19, 256, %s43_s23, [#allocation6], %s317_s20, %s317_s20, %s318_s21  }
   0xa   :  { %308 = dma.done.wait [#allocation3], 256  }
   0xb   :  { %309 = vsyncadd [#allocation3], 4294967040 }
   0xc   :  { %310 = dma.done.wait [#allocation6], 256  }
   0xd   :  { %311 = vsyncadd [#allocation6], 4294967040  ;;  %v71_v0 = vld [vmem:[#allocation2] sm:$0xff]  ;;  %v72_v1 = vld [vmem:[#allocation2 + $0x8] sm:$0xff]  ;;  %v122_v4 = vlaneseq  ;;  %s320_s0 = smov [#allocation7]   ;;  %s161_s26 = sshll.u32 %s368_s2, 4  ;;  %s162_s26 = int_to_ptr.hbm [resolvable:$true] %s161_s26 }
   0xe   :  { %v73_v2 = vmul.f32 0.5, %v71_v0  ;;  %v74_v3 = vmul.f32 0.5, %v72_v1  ;;  %v89_v18 = vld [vmem:[#allocation5] sm:$0xff]  ;;  %v90_v21 = vld [vmem:[#allocation5 + $0x8] sm:$0xff]  ;;  %s159_s1 = sshll.u32 %s320_s0, 4  ;;  %s321_s27 = smov [#allocation8]   ;;  %s160_s1 = int_to_ptr.vmem [resolvable:$true] %s159_s1 }
   0xf   :  { %v123_v8 = vshrl.u32 %v122_v4, 7  ;;  %v125_v13 = vand.u32 127, %v122_v4  ;;  %s172_s28 = sshll.u32 %s321_s27, 4  ;;  %s174_s4 = sshll.u32 %s369_s3, 4  ;;  %s173_s28 = int_to_ptr.vmem [resolvable:$true] %s172_s28  ;;  %s175_s4 = int_to_ptr.hbm [resolvable:$true] %s174_s4 }
  0x10   :  { %204 = vtanh.f32 %v73_v2 }
  0x11   :  { %206 = vtanh.f32 %v74_v3  ;;  %v126_v14 = vmul.u32 128, %v123_v8 }
  0x13   :  { %v129_v16 = vadd.s32 %v126_v14, %v125_v13 }
  0x15   :  { %vm130_vm0 = vcmp.lt.s32.totalorder %v129_v16, 256 }
  0x16   :  { %v205_v5 = vpop.eup %204  ;;  %v133_v24 = vsel %vm130_vm0, %v89_v18, 0.0  ;;  %v134_v26 = vsel %vm130_vm0, %v90_v21, 0.0 }
  0x17   :  { %v207_v6 = vpop.eup %206  ;;  %v77_v7 = vadd.f32 1.0, %v205_v5 }
  0x18   :  { %v78_v9 = vadd.f32 1.0, %v207_v6 }
  0x19   :  { %v79_v10 = vmul.f32 0.5, %v77_v7 }
  0x1a   :  { %v80_v11 = vmul.f32 0.5, %v78_v9 }
  0x1b   :  { %v81_v12 = vmul.f32 0.5, %v79_v10 }
  0x1c   :  { %v82_v15 = vmul.f32 0.5, %v80_v11 }
  0x1d   :  { %208 = vtanh.f32 %v81_v12 }
  0x1e   :  { %210 = vtanh.f32 %v82_v15 }
  0x23   :  { %v209_v17 = vpop.eup %208 }
  0x24   :  { %v211_v19 = vpop.eup %210  ;;  %v85_v20 = vadd.f32 1.0, %v209_v17 }
  0x25   :  { %v86_v22 = vadd.f32 1.0, %v211_v19 }
  0x26   :  { %v87_v23 = vmul.f32 0.5, %v85_v20 }
  0x27   :  { %v88_v25 = vmul.f32 0.5, %v86_v22 }
  0x28   :  { %v131_v27 = vsel %vm130_vm0, %v87_v23, 0.0 }
  0x29   :  { %v137_v28 = vmul.f32 %v133_v24, %v131_v27  ;;  %v132_v29 = vsel %vm130_vm0, %v88_v25, 0.0  ;;  %v147_v30 = vadd.f32 %v133_v24, %v131_v27 }
  0x2a   :  { %v138_v31 = vmul.f32 %v134_v26, %v132_v29  ;;  %v148_v32 = vadd.f32 %v134_v26, %v132_v29 }
  0x2b   :  { %143 = vst [vmem:[#allocation7] sm:$0xff] %v137_v28 }
  0x2c   :  { %144 = vst [vmem:[#allocation7 + $0x8] sm:$0xff] %v138_v31 }
  0x2d   :  { %153 = vst [vmem:[#allocation8] sm:$0xff] %v147_v30  ;;  %167 = dma.vmem_to_hbm [thread:$0]  %s160_s1, 256, %s162_s26, [#allocation4], %s317_s20, %s317_s20, %s318_s21  }
  0x2e   :  { %154 = vst [vmem:[#allocation8 + $0x8] sm:$0xff] %v148_v32 }
  0x2f   :  { %180 = dma.vmem_to_hbm [thread:$0]  %s173_s28, 256, %s175_s4, [#allocation9], %s317_s20, %s317_s20, %s318_s21  }
  0x30   :  { %312 = dma.done.wait [#allocation4], 256  }
  0x31   :  { %313 = vsyncadd [#allocation4], 4294967040 }
  0x32   :  { %314 = dma.done.wait [#allocation9], 256  }
  0x33   :  { %315 = vsyncadd [#allocation9], 4294967040 }
  0x34   :  { %189 = vsyncpa [#allocation3], 1 }
  0x35   :  { %190 = vsyncpa [#allocation6], 1 }
  0x36   :  { %191 = vsyncpa [#allocation4], 1 }
  0x37   :  { %192 = vsyncpa [#allocation9], 1 }

</bundles_post_ra>
